<compile_context>
chip_gen: v5e
topology: v5e:2x2
jax: 0.10.0
libtpu: 0.0.40
codegen_flags: <defaults>
</compile_context>

<pallas_src>
import jax
import jax.numpy as jnp
from jax.experimental import pallas as pl
from jax.experimental.pallas import tpu as pltpu

MAX_ROWS_PER_BLOCK = 128          # static unroll / per-step DMA count cap
SEM_POOL = 8                      # DMA semaphore pool size (constant footprint)
VMEM_TABLE_LIMIT_BYTES = 4 << 20  # fast-path threshold, safe on v5e/v6e/v7x


def _cdiv(a, b):
    return -(-a // b)


def _round_up(a, m):
    return _cdiv(a, m) * m


def _choose_rows_per_block(n):
    """Rows gathered per grid step (static Python int, multiple of 8)."""
    n8 = max(8, _round_up(n, 8))
    n_steps = _cdiv(n8, MAX_ROWS_PER_BLOCK)
    if n_steps == 1 and n8 >= 16:
        # Prefer >=2 grid steps so the "parallel" axis can be sharded across
        # v7x's two TensorCores (harmless no-op on single-TC v5e/v6e).
        n_steps = 2
    return max(8, _round_up(_cdiv(n8, n_steps), 8))


# --------------------------------------------------------------------------
# Path 1: large table stays in HBM, per-row DMA gather straight into out_ref.
# --------------------------------------------------------------------------
def _gather_rows_hbm_kernel(ids_ref, emb_hbm, out_ref, sems):
    """Gather `rows` rows of the HBM-resident table into the output block.

    ids_ref : SMEM (N_pad,) int32   -- scalar-prefetched row ids
    emb_hbm : HBM  (V, D)   float   -- embedding table, left in place
    out_ref : VMEM (rows, D)        -- output block; also the DMA landing area
    sems    : DMA semaphore pool (SEM_POOL,)
    """
    rows = out_ref.shape[0]
    base = pl.program_id(0) * rows
    copies = []
    # All SMEM id reads and all DMA starts happen before any wait
    # (cp.wait() breaks SMEM sst->sld forwarding), and all `rows` row DMAs
    # are in flight simultaneously to hide per-row HBM latency.
    for r in range(rows):                      # static unroll
        row_id = ids_ref[base + r]
        cp = pltpu.make_async_copy(
            emb_hbm.at[pl.ds(row_id, 1), :],
            out_ref.at[pl.ds(r, 1), :],        # DMA straight into the output block
            sems.at[r % SEM_POOL],
        )
        cp.start()
        copies.append(cp)
    for cp in copies:
        cp.wait()


def _gather_rows_hbm(ids, emb, rows_per_block):
    n_pad, = ids.shape
    _, d = emb.shape
    grid = (n_pad // rows_per_block,)
    bytes_accessed = int(2 * n_pad * d * emb.dtype.itemsize + n_pad * 4)
    return pl.pallas_call(
        _gather_rows_hbm_kernel,
        out_shape=jax.ShapeDtypeStruct((n_pad, d), emb.dtype),
        grid_spec=pltpu.PrefetchScalarGridSpec(
            num_scalar_prefetch=1,
            grid=grid,
            in_specs=[pl.BlockSpec(memory_space=pl.ANY)],   # table stays in HBM
            out_specs=pl.BlockSpec((rows_per_block, d), lambda i, ids: (i, 0)),
            scratch_shapes=[pltpu.SemaphoreType.DMA((SEM_POOL,))],
        ),
        compiler_params=pltpu.CompilerParams(
            dimension_semantics=("parallel",)),             # megacore on v7x
        cost_estimate=pl.CostEstimate(
            flops=0, transcendentals=0, bytes_accessed=bytes_accessed),
    )(ids, emb)


# --------------------------------------------------------------------------
# Path 2: small table resident in VMEM, one-hot MXU gather.
# --------------------------------------------------------------------------
def _gather_rows_vmem_kernel(ids_ref, emb_ref, out_ref):
    """ids_ref: VMEM (rows,1) int32; emb_ref: VMEM (V,D); out_ref: VMEM (rows,D)."""
    ids = ids_ref[...]                                        # (rows, 1)
    rows = ids.shape[0]
    v = emb_ref.shape[0]
    cols = jax.lax.broadcasted_iota(jnp.int32, (rows, v), 1)
    one_hot = (cols == ids).astype(emb_ref.dtype)             # (rows, V)
    out_ref[...] = jnp.dot(one_hot, emb_ref[...],
                           preferred_element_type=jnp.float32
                           ).astype(out_ref.dtype)


def _gather_rows_vmem(ids, emb, rows_per_block):
    n_pad, = ids.shape
    v, d = emb.shape
    ids2d = ids.reshape(n_pad, 1)
    grid = (n_pad // rows_per_block,)
    flops = int(2 * n_pad * v * d)
    bytes_accessed = int((v * d + 2 * n_pad * d) * emb.dtype.itemsize + n_pad * 4)
    return pl.pallas_call(
        _gather_rows_vmem_kernel,
        out_shape=jax.ShapeDtypeStruct((n_pad, d), emb.dtype),
        grid_spec=pltpu.PrefetchScalarGridSpec(
            num_scalar_prefetch=0,
            grid=grid,
            in_specs=[
                pl.BlockSpec((rows_per_block, 1), lambda i: (i, 0)),
                # Full-array block, constant index -> fetched into VMEM once.
                pl.BlockSpec((v, d), lambda i: (0, 0)),
            ],
            out_specs=pl.BlockSpec((rows_per_block, d), lambda i: (i, 0)),
        ),
        compiler_params=pltpu.CompilerParams(
            dimension_semantics=("parallel",)),
        cost_estimate=pl.CostEstimate(
            flops=flops, transcendentals=0, bytes_accessed=bytes_accessed),
    )(ids2d, emb)


# --------------------------------------------------------------------------
# Wrapper: matches NearestNeighbor.forward(path, word, lengths, batch_size).
# --------------------------------------------------------------------------
def nearest_neighbor_forward(path, word, lengths, pretrain_embedding,
                             *, vmem_table_limit_bytes=VMEM_TABLE_LIMIT_BYTES):
    """Returns (word_embed, label), each (batch, dim_embedding)."""
    batch, path_len = path.shape
    num_emb, dim_emb = pretrain_embedding.shape

    # Last valid hypernym per row (tiny XLA gather keeps the 2-D path array
    # out of SMEM), then merge word + label lookups into one index vector.
    lengths = lengths.reshape(-1).astype(jnp.int32)           # mimics .squeeze()
    last_pos = jnp.clip(lengths - 1, 0, path_len - 1)         # lengths==0 -> 0
    last_ids = path[jnp.arange(batch), last_pos]
    ids = jnp.concatenate([word.reshape(-1).astype(jnp.int32),
                           last_ids.astype(jnp.int32)])
    ids = jnp.clip(ids, 0, num_emb - 1)    # guard untrusted / padding ids
                                           # (torch.nn.Embedding would raise)

    n = 2 * batch
    rows_per_block = _choose_rows_per_block(n)
    n_pad = _round_up(n, rows_per_block)
    if n_pad != n:
        ids = jnp.pad(ids, (0, n_pad - n))   # padded rows gather row 0 (valid)

    table_bytes = num_emb * dim_emb * pretrain_embedding.dtype.itemsize
    if table_bytes <= vmem_table_limit_bytes:
        gathered = _gather_rows_vmem(ids, pretrain_embedding, rows_per_block)
    else:
        gathered = _gather_rows_hbm(ids, pretrain_embedding, rows_per_block)

    word_embed = gathered[:batch]
    label = gathered[batch:n]
    return word_embed, label


if __name__ == "__main__":
    # Small, deterministic example shapes consistent with the module's forward.
    batch_size = 4
    max_len = 8          # path_len
    num_embedding = 64   # vocabulary of synsets
    dim_embedding = 128  # embedding width

    key = jax.random.PRNGKey(0)
    k_emb, k_path, k_word, k_len = jax.random.split(key, 4)

    pretrain_embedding = jax.random.normal(
        k_emb, (num_embedding, dim_embedding), dtype=jnp.float32)
    path = jax.random.randint(
        k_path, (batch_size, max_len), 0, num_embedding, dtype=jnp.int32)
    word = jax.random.randint(
        k_word, (batch_size,), 0, num_embedding, dtype=jnp.int32)
    lengths = jax.random.randint(
        k_len, (batch_size,), 1, max_len + 1, dtype=jnp.int32)

    # Plain-JAX reference.
    ref_last_ids = path[jnp.arange(batch_size), lengths - 1]
    ref_label = jnp.take(pretrain_embedding, ref_last_ids, axis=0)
    ref_word = jnp.take(pretrain_embedding, word, axis=0)

    # 1) Default dispatch: small table -> VMEM-resident one-hot MXU gather.
    word_embed, label = nearest_neighbor_forward(path, word, lengths,
                                                 pretrain_embedding)
    jax.block_until_ready((word_embed, label))
    assert word_embed.shape == (batch_size, dim_embedding)
    assert label.shape == (batch_size, dim_embedding)
    assert jnp.allclose(word_embed, ref_word)
    assert jnp.allclose(label, ref_label)

    # 2) Force the HBM row-DMA gather path (what large vocabularies take).
    word_embed2, label2 = nearest_neighbor_forward(
        path, word, lengths, pretrain_embedding, vmem_table_limit_bytes=0)
    jax.block_until_ready((word_embed2, label2))
    assert jnp.allclose(word_embed2, ref_word)
    assert jnp.allclose(label2, ref_label)

    print("KERNEL_OK")
</pallas_src>

<mosaic_0001>
module attributes {stable_mosaic.version = 11 : i64} {
  func.func @_gather_rows_vmem_kernel(%arg0: i32, %arg1: memref<8x1xi32, #tpu.memory_space<vmem>>, %arg2: memref<64x128xf32, #tpu.memory_space<vmem>>, %arg3: memref<8x128xf32, #tpu.memory_space<vmem>>) attributes {dimension_semantics = [#tpu.dimension_semantics<parallel>], iteration_bounds = array<i64: 1>, scalar_prefetch = 0 : i64, scratch_operands = 0 : i64, tpu.core_type = #tpu.core_type<tc>, window_params = [{transform_indices = @transform_0, window_bounds = array<i64: 8, 1>}, {pipeline_mode = #tpu.pipeline_mode<synchronous>, transform_indices = @transform_1, window_bounds = array<i64: 64, 128>}, {transform_indices = @transform_2, window_bounds = array<i64: 8, 128>}]} {
    %c0 = arith.constant 0 : index
    %c0_0 = arith.constant 0 : index
    %0 = vector.load %arg1[%c0, %c0_0] : memref<8x1xi32, #tpu.memory_space<vmem>>, vector<8x1xi32>
    %1 = tpu.iota {dimensions = array<i32: 1>} : vector<8x64xi32>
    %2 = vector.broadcast %0 : vector<8x1xi32> to vector<8x64xi32>
    %3 = arith.cmpi eq, %1, %2 : vector<8x64xi32>
    %4 = arith.extui %3 : vector<8x64xi1> to vector<8x64xi32>
    %5 = arith.sitofp %4 : vector<8x64xi32> to vector<8x64xf32>
    %c0_1 = arith.constant 0 : index
    %c0_2 = arith.constant 0 : index
    %6 = vector.load %arg2[%c0_1, %c0_2] : memref<64x128xf32, #tpu.memory_space<vmem>>, vector<64x128xf32>
    %cst = arith.constant dense<0.000000e+00> : vector<8x128xf32>
    %7 = tpu.matmul %5, %6, %cst {dimension_numbers = #tpu.dot_dimension_numbers<[1], [0], [0], [1], [0, 0, 1, 1], [], []>} : vector<8x64xf32>, vector<64x128xf32>, vector<8x128xf32> -> vector<8x128xf32>
    %c0_3 = arith.constant 0 : index
    %c0_4 = arith.constant 0 : index
    %8 = vector.load %arg3[%c0_3, %c0_4] : memref<8x128xf32, #tpu.memory_space<vmem>>, vector<8x128xf32>
    tpu.vector_store %arg3[%c0_3, %c0_4], %7 {strides = array<i32>} : memref<8x128xf32, #tpu.memory_space<vmem>>, vector<8x128xf32>,
    return
  }
  func.func @transform_0(%arg0: i32) -> (i32, i32) {
    %c0_i32 = arith.constant 0 : i32
    %c0_i32_0 = arith.constant 0 : i32
    return %arg0, %c0_i32 : i32, i32
  }
  func.func @transform_1(%arg0: i32) -> (i32, i32) {
    %c0_i32 = arith.constant 0 : i32
    %c0_i32_0 = arith.constant 0 : i32
    %c0_i32_1 = arith.constant 0 : i32
    return %c0_i32, %c0_i32_0 : i32, i32
  }
  func.func @transform_2(%arg0: i32) -> (i32, i32) {
    %c0_i32 = arith.constant 0 : i32
    %c0_i32_0 = arith.constant 0 : i32
    return %arg0, %c0_i32 : i32, i32
  }
}

</mosaic_0001>

<bundles_post_ra>
// kernel: tpu_custom_call.1
= control target key start
LH: loop header
LB: loop body
LE: loop exit
PB: predicated region body
PF: predicated region fallthrough
CT: control target
= control target key end

     0   :  { %7 = vsyncpa [#allocation3], 0  ;;  %s178_s0 = inlined_call_operand.vmem [shape: s32[8,1], index: 0, kind: input, shape index: {}]   ;;  %s179_s1 = inlined_call_operand.hbm [shape: f32[64,128], index: 1, kind: input, shape index: {}]   ;;  %s180_s2 = inlined_call_operand.hbm [shape: f32[8,128], index: 2, kind: output, shape index: {}]  }
   0x1   :  { %8 = vsyncpa [#allocation4], 0  ;;  %s15_s11 = sshll.u32 %s179_s1, 4  ;;  %s148_s12 = smov [#allocation2]   ;;  %s16_s11 = int_to_ptr.hbm [resolvable:$true] %s15_s11 }
   0x2   :  { %s17_s13 = sshll.u32 %s148_s12, 4  ;;  %s149_s14 = smov 128   ;;  %s18_s13 = int_to_ptr.vmem [resolvable:$true] %s17_s13 }
   0x3   :  { %s150_s15 = smov 8  }
   0x4   :  { %23 = dma.hbm_to_vmem [thread:$0]  %s16_s11, 1024, %s18_s13, [#allocation3], %s149_s14, %s149_s14, %s150_s15  }
   0x5   :  { %144 = dma.done.wait [#allocation3], 1024  }
   0x6   :  { %145 = vsyncadd [#allocation3], 4294966272  ;;  %v151_v0 = vmov 0   ;;  %v28_v1 = vld [vmem:[%s178_s0] sm:$0xff]  ;;  %v44_v2 = vld [vmem:[#allocation2 + $0x38] sm:$0xff]  ;;  %v29_v10 = vlaneseq  ;;  %vm45_vm0 = vcmask 523264  }
   0x7   :  { %95 = vset.pattern.permute.xlu0 %v151_v0  ;;  %v43_v3 = vld [vmem:[#allocation2 + $0x30] sm:$0xff]  ;;  %57 = vmatpush.msra.mxu0 %v44_v2  ;;  %v42_v4 = vld [vmem:[#allocation2 + $0x28] sm:$0xff]  ;;  %v41_v5 = vld [vmem:[#allocation2 + $0x20] sm:$0xff]  ;;  %v152_v13 = vmov 0.0   ;;  %s153_s0 = smov [#allocation5]   ;;  %s77_s20 = sshll.u32 %s180_s2, 4  ;;  %s78_s20 = int_to_ptr.hbm [resolvable:$true] %s77_s20 }
   0x8   :  { %32 = vperm.xlu0 %95, %v28_v1   ;;  %v40_v6 = vld [vmem:[#allocation2 + $0x18] sm:$0xff]  ;;  %v39_v7 = vld [vmem:[#allocation2 + $0x10] sm:$0xff]  ;;  %v38_v8 = vld [vmem:[#allocation2 + $0x8] sm:$0xff]  ;;  %v30_v11 = vand.u32 127, %v29_v10  ;;  %s75_s1 = sshll.u32 %s153_s0, 4  ;;  %s76_s1 = int_to_ptr.vmem [resolvable:$true] %s75_s1 }
   0x9   :  { %58 = vmatpush.msra.mxu0 %v43_v3  ;;  %v37_v9 = vld [vmem:[#allocation2] sm:$0xff] }
   0xb   :  { %59 = vmatpush.msra.mxu0 %v42_v4 }
   0xd   :  { %60 = vmatpush.msra.mxu0 %v41_v5 }
   0xf   :  { %61 = vmatpush.msra.mxu0 %v40_v6 }
  0x11   :  { %62 = vmatpush.msra.mxu0 %v39_v7 }
  0x13   :  { %63 = vmatpush.msra.mxu0 %v38_v8 }
  0x15   :  { %64 = vmatpush.msra.mxu0 %v37_v9 }
  0x7a   :  { %v33_v12 = vpop.permute.xlu0 %32 }
  0x7b   :  { %vm34_vm1 = vcmp.eq.s32.totalorder %v30_v11, %v33_v12 }
  0x7c   :  { %v87_v14 = vsel %vm34_vm1, 1.0, %v152_v13 }
  0x7d   :  { %88 = vmatmul.msk.f32.vlgmr.msra.gmra.mxu0 %vm45_vm0, %v87_v14 }
  0xfa   :  { %v66_v15 = vpop.f32.mrf.mxu0 }
  0xfb   :  { %69 = vst [vmem:[#allocation5] sm:$0xff] %v66_v15 }
  0xfc   :  { %80 = dma.vmem_to_hbm [thread:$0]  %s76_s1, 128, %s78_s20, [#allocation4]  }
  0xfd   :  { %146 = dma.done.wait [#allocation4], 128  }
  0xfe   :  { %147 = vsyncadd [#allocation4], 4294967168 }
  0xff   :  { %85 = vsyncpa [#allocation3], 1 }
 0x100   :  { %86 = vsyncpa [#allocation4], 1 }

</bundles_post_ra>
